<compile_context>
chip_gen: v7x
topology: tpu7x:2x2x1
jax: 0.10.0
libtpu: 0.0.40
codegen_flags: <defaults>
</compile_context>

<pallas_src>
import functools

import jax
import jax.numpy as jnp
from jax.experimental import pallas as pl
from jax.experimental.pallas import tpu as pltpu


def _residual_block_kernel(x_ref, w1_ref, w2_ref, t_ref, res_ref, h2_ref,
                           *, K, D, left, L, BL, P):
    """One grid step = B batch elements flattened along lanes (BL = B * L).

    x_ref  : (C, BL)        bf16  element b occupies lanes [b*L, (b+1)*L)
    w1_ref : ((K+1)*P, C)   bf16  rows [k*P:(k+1)*P] = block1 tap k (BN folded),
                                  rows [K*P:(K+1)*P] = residual 1x1 conv
    w2_ref : (K*P, P)       bf16  rows [k*P:(k+1)*P] = block2 tap k (BN folded)
    t_ref  : (3, P, 1)      f32   [0]=block1 bias, [1]=block2 bias, [2]=residual bias
    res_ref, h2_ref : (P, BL) outputs (dense sublanes/lanes; cropped in wrapper)
    """
    f32 = jnp.float32
    x = x_ref[...]                       # (C, BL) bf16
    w1 = w1_ref[...]                     # (F1, C) bf16
    w2 = w2_ref[...]                     # (F2, P) bf16
    t = t_ref[...]                       # (3, P, 1) f32  (built once per step)

    # Lane position within its own batch element.  The 'same'-padding validity
    # masks are periodic with period L, so one iota (+ one rem) serves every
    # tap of both convolutions.
    lane = jax.lax.broadcasted_iota(jnp.int32, (P, BL), 1)
    pos = lane if BL == L else lane % L

    def dilated_tap_sum(y):
        # out[:, l] = sum_k y[k*P:(k+1)*P, l + k*D - left], zero outside [0, L)
        # of the owning element.  Rolls are cyclic over BL; the masks kill both
        # the 'same'-padding region and any cross-element / wrap leakage.
        acc = None
        for k in range(K):
            s = k * D - left                       # static per-tap shift
            v = y[k * P:(k + 1) * P, :]            # 8-aligned sublane slice
            if s != 0:
                v = pltpu.roll(v, shift=(-s) % BL, axis=1)   # v'[l] = y[l + s]
                if s > 0:
                    v = jnp.where(pos < L - s, v, 0.0)
                else:
                    v = jnp.where(pos >= -s, v, 0.0)
            acc = v if acc is None else acc + v
        return acc

    # ---- block1 (K taps) + residual 1x1 conv: ONE MXU matmul -----------------
    y1 = jnp.dot(w1, x, preferred_element_type=f32)        # ((K+1)*P, BL) f32
    h1 = jnp.maximum(dilated_tap_sum(y1) + t[0], 0.0)      # (P, BL) f32
    pre = y1[K * P:(K + 1) * P, :] + t[2]                  # residual path (no ReLU)

    # ---- block2: ONE MXU matmul ----------------------------------------------
    y2 = jnp.dot(w2, h1.astype(w2.dtype), preferred_element_type=f32)  # (K*P, BL)
    h2 = jnp.maximum(dilated_tap_sum(y2) + t[1], 0.0)

    res = jnp.maximum(h2 + pre, 0.0)
    res_ref[...] = res.astype(res_ref.dtype)
    h2_ref[...] = h2.astype(h2_ref.dtype)


def residual_block(x, params, *, kernel_size, dilation, eps=1e-5):
    """x: (N, C, L).  Returns (res_x, x_block2) matching the PyTorch forward (eval)."""
    N, C, L = x.shape
    K, D = kernel_size, dilation

    w1, b1, g1, be1, m1, v1 = params['block1']
    w2, b2, g2, be2, m2, v2 = params['block2']
    wr, br = params['res']
    O = w1.shape[0]
    # The PyTorch module only type-checks when in_chan == out_chan (block2 is
    # declared with in_chan inputs but fed block1's out_chan-channel output).
    assert C == O, "Residual_Block requires in_chan == out_chan"

    total = D * (K - 1)                   # PyTorch padding='same'
    left = total // 2
    P = ((O + 7) // 8) * 8                # output rows padded to the f32 sublane tile
    F1 = (K + 1) * P
    F2 = K * P

    f32 = jnp.float32
    bf16 = jnp.bfloat16

    # ---- fold eval-mode BatchNorm into the conv weights / biases -------------
    s1 = (g1 / jnp.sqrt(v1 + eps)).astype(f32)
    s2 = (g2 / jnp.sqrt(v2 + eps)).astype(f32)
    t1 = ((b1 - m1) * s1 + be1).astype(f32)
    t2 = ((b2 - m2) * s2 + be2).astype(f32)
    tr = br.astype(f32)
    w1f = w1.astype(f32) * s1[:, None, None]       # (O, C, K)
    w2f = w2.astype(f32) * s2[:, None, None]       # (O, O, K)
    wr2 = wr[:, :, 0].astype(f32)                  # (O, C)

    # ---- pack weights (taps stacked along the matmul output dim), bf16 -------
    w1rows = jnp.pad(jnp.transpose(w1f, (2, 0, 1)),
                     ((0, 0), (0, P - O), (0, 0))).reshape(K * P, C)
    wr_rows = jnp.pad(wr2, ((0, P - O), (0, 0)))                      # (P, C)
    W1pk = jnp.concatenate([w1rows, wr_rows], axis=0).astype(bf16)    # (F1, C)
    W2pk = jnp.pad(jnp.transpose(w2f, (2, 0, 1)),
                   ((0, 0), (0, P - O), (0, P - O))).reshape(F2, P).astype(bf16)
    tpk = jnp.stack([jnp.pad(t1, (0, P - O)),
                     jnp.pad(t2, (0, P - O)),
                     jnp.pad(tr, (0, P - O))], axis=0)[:, :, None]    # (3, P, 1) f32

    # ---- choose B = batch elements per grid step ------------------------------
    # Largest divisor of N whose lane width B*L is 128-aligned (or B == N, which
    # uses the full-array-dim BlockSpec exception) and fits a VMEM budget that is
    # also safe on v7x (smaller physical VMEM).
    vmem_budget = 24 * 1024 * 1024
    bytes_per_lane = (2 * K + 8) * P * 4          # y1 + y2 + f32 temporaries per lane
    lane_budget = max(128, vmem_budget // bytes_per_lane)
    cands = [b for b in range(1, N + 1)
             if N % b == 0 and (b == N or (b * L) % 128 == 0)]
    fit = [b for b in cands if b * L <= lane_budget]
    B = max(fit) if fit else min(cands)
    BL = B * L

    # Lane-dense input slab: (C, N*L) bf16.  This is the only wrapper-side copy
    # of x (half the bytes of the input), replacing the old f32 (N, P, Lq) pad.
    xT = jnp.transpose(x, (1, 0, 2)).reshape(C, N * L).astype(bf16)

    kernel = functools.partial(_residual_block_kernel,
                               K=K, D=D, left=left, L=L, BL=BL, P=P)

    res_p, h2_p = pl.pallas_call(
        kernel,
        out_shape=(jax.ShapeDtypeStruct((P, N * L), x.dtype),
                   jax.ShapeDtypeStruct((P, N * L), x.dtype)),
        grid=(N // B,),
        in_specs=[pl.BlockSpec((C, BL), lambda i: (0, i)),
                  pl.BlockSpec((F1, C), lambda i: (0, 0)),
                  pl.BlockSpec((F2, P), lambda i: (0, 0)),
                  pl.BlockSpec((3, P, 1), lambda i: (0, 0, 0))],
        out_specs=(pl.BlockSpec((P, BL), lambda i: (0, i)),
                   pl.BlockSpec((P, BL), lambda i: (0, i))),
        compiler_params=pltpu.CompilerParams(
            dimension_semantics=("parallel",)),
    )(xT, W1pk, W2pk, tpk)

    # Crop / re-layout outputs with plain XLA slices (stores stayed tile-dense).
    res = jnp.transpose(res_p.reshape(P, N, L), (1, 0, 2))[:, :O, :]
    h2 = jnp.transpose(h2_p.reshape(P, N, L), (1, 0, 2))[:, :O, :]
    return res, h2


def _reference(x, params, *, kernel_size, dilation, eps=1e-5):
    """Pure-JAX reference (lax conv, f32) for a correctness sanity check."""
    K, D = kernel_size, dilation
    total = D * (K - 1)
    left, right = total // 2, total - total // 2
    dn = ('NCH', 'OIH', 'NCH')

    def conv(inp, w, b, pad):
        y = jax.lax.conv_general_dilated(inp, w, window_strides=(1,),
                                         padding=pad, rhs_dilation=(D,),
                                         dimension_numbers=dn)
        return y + b[None, :, None]

    def bn(y, g, be, m, v):
        return (y - m[None, :, None]) / jnp.sqrt(v[None, :, None] + eps) * \
               g[None, :, None] + be[None, :, None]

    w1, b1, g1, be1, m1, v1 = params['block1']
    w2, b2, g2, be2, m2, v2 = params['block2']
    wr, br = params['res']

    pre = jax.lax.conv_general_dilated(x, wr, (1,), [(0, 0)],
                                       dimension_numbers=dn) + br[None, :, None]
    h1 = jax.nn.relu(bn(conv(x, w1, b1, [(left, right)]), g1, be1, m1, v1))
    h2 = jax.nn.relu(bn(conv(h1, w2, b2, [(left, right)]), g2, be2, m2, v2))
    return jax.nn.relu(h2 + pre), h2


if __name__ == "__main__":
    # Small deterministic config: in_chan == out_chan (required by the module).
    N, C, O, L = 2, 4, 4, 128
    K, D = 3, 2

    key = jax.random.PRNGKey(0)
    ks = jax.random.split(key, 16)
    f32 = jnp.float32

    params = {
        'block1': (
            0.3 * jax.random.normal(ks[0], (O, C, K), f32),    # conv weight
            0.1 * jax.random.normal(ks[1], (O,), f32),         # conv bias
            1.0 + 0.1 * jax.random.normal(ks[2], (O,), f32),   # BN gamma
            0.1 * jax.random.normal(ks[3], (O,), f32),         # BN beta
            0.1 * jax.random.normal(ks[4], (O,), f32),         # BN running_mean
            1.0 + 0.1 * jax.random.uniform(ks[5], (O,), f32),  # BN running_var
        ),
        'block2': (
            0.3 * jax.random.normal(ks[6], (O, C, K), f32),
            0.1 * jax.random.normal(ks[7], (O,), f32),
            1.0 + 0.1 * jax.random.normal(ks[8], (O,), f32),
            0.1 * jax.random.normal(ks[9], (O,), f32),
            0.1 * jax.random.normal(ks[10], (O,), f32),
            1.0 + 0.1 * jax.random.uniform(ks[11], (O,), f32),
        ),
        'res': (
            0.3 * jax.random.normal(ks[12], (O, C, 1), f32),   # 1x1 conv weight
            0.1 * jax.random.normal(ks[13], (O,), f32),        # 1x1 conv bias
        ),
    }

    x = jax.random.normal(ks[14], (N, C, L), f32)

    res, h2 = residual_block(x, params, kernel_size=K, dilation=D)
    res = jax.block_until_ready(res)
    h2 = jax.block_until_ready(h2)

    res_ref, h2_ref = _reference(x, params, kernel_size=K, dilation=D)
    # bf16 MXU operands (two chained convs) -> loosened tolerance vs. f32 ref.
    assert jnp.allclose(res, res_ref, rtol=5e-2, atol=5e-2), "res mismatch"
    assert jnp.allclose(h2, h2_ref, rtol=5e-2, atol=5e-2), "h2 mismatch"

    print("KERNEL_OK")
</pallas_src>

<mosaic_0001>
module attributes {stable_mosaic.version = 11 : i64} {
  func.func @_residual_block_kernel(%arg0: i32, %arg1: memref<4x256xbf16, #tpu.memory_space<vmem>>, %arg2: memref<32x4xbf16, #tpu.memory_space<vmem>>, %arg3: memref<24x8xbf16, #tpu.memory_space<vmem>>, %arg4: memref<3x8x1xf32, #tpu.memory_space<vmem>>, %arg5: memref<8x256xf32, #tpu.memory_space<vmem>>, %arg6: memref<8x256xf32, #tpu.memory_space<vmem>>) attributes {dimension_semantics = [#tpu.dimension_semantics<parallel>], iteration_bounds = array<i64: 1>, scalar_prefetch = 0 : i64, scratch_operands = 0 : i64, tpu.core_type = #tpu.core_type<tc>, window_params = [{transform_indices = @transform_0, window_bounds = array<i64: 4, 256>}, {pipeline_mode = #tpu.pipeline_mode<synchronous>, transform_indices = @transform_1, window_bounds = array<i64: 32, 4>}, {pipeline_mode = #tpu.pipeline_mode<synchronous>, transform_indices = @transform_2, window_bounds = array<i64: 24, 8>}, {pipeline_mode = #tpu.pipeline_mode<synchronous>, transform_indices = @transform_3, window_bounds = array<i64: 3, 8, 1>}, {transform_indices = @transform_4, window_bounds = array<i64: 8, 256>}, {transform_indices = @transform_5, window_bounds = array<i64: 8, 256>}]} {
    %c0 = arith.constant 0 : index
    %c0_0 = arith.constant 0 : index
    %0 = vector.load %arg1[%c0, %c0_0] : memref<4x256xbf16, #tpu.memory_space<vmem>>, vector<4x256xbf16>
    %c0_1 = arith.constant 0 : index
    %c0_2 = arith.constant 0 : index
    %1 = vector.load %arg2[%c0_1, %c0_2] : memref<32x4xbf16, #tpu.memory_space<vmem>>, vector<32x4xbf16>
    %c0_3 = arith.constant 0 : index
    %c0_4 = arith.constant 0 : index
    %2 = vector.load %arg3[%c0_3, %c0_4] : memref<24x8xbf16, #tpu.memory_space<vmem>>, vector<24x8xbf16>
    %c0_5 = arith.constant 0 : index
    %c0_6 = arith.constant 0 : index
    %c0_7 = arith.constant 0 : index
    %3 = vector.load %arg4[%c0_5, %c0_6, %c0_7] : memref<3x8x1xf32, #tpu.memory_space<vmem>>, vector<3x8x1xf32>
    %4 = tpu.iota {dimensions = array<i32: 1>} : vector<8x256xi32>
    %c128_i32 = arith.constant 128 : i32
    %c0_i32 = arith.constant 0 : i32
    %5 = arith.cmpi eq, %c128_i32, %c0_i32 : i32
    %c1_i32 = arith.constant 1 : i32
    %6 = arith.select %5, %c1_i32, %c128_i32 : i32
    %7 = vector.broadcast %6 : i32 to vector<8x256xi32>
    %8 = arith.remsi %4, %7 : vector<8x256xi32>
    %c0_i32_8 = arith.constant 0 : i32
    %9 = vector.broadcast %c0_i32_8 : i32 to vector<8x256xi32>
    %10 = arith.cmpi ne, %8, %9 : vector<8x256xi32>
    %c0_i32_9 = arith.constant 0 : i32
    %11 = vector.broadcast %c0_i32_9 : i32 to vector<8x256xi32>
    %12 = arith.cmpi slt, %8, %11 : vector<8x256xi32>
    %c0_i32_10 = arith.constant 0 : i32
    %13 = arith.cmpi slt, %6, %c0_i32_10 : i32
    %14 = vector.broadcast %13 : i1 to vector<8x256xi1>
    %15 = vector.broadcast %14 : vector<8x256xi1> to vector<8x256xi1>
    %16 = arith.xori %12, %15 : vector<8x256xi1>
    %17 = arith.andi %16, %10 : vector<8x256xi1>
    %18 = vector.broadcast %6 : i32 to vector<8x256xi32>
    %19 = arith.addi %8, %18 : vector<8x256xi32>
    %20 = arith.select %17, %19, %8 : vector<8x256xi1>, vector<8x256xi32>
    %cst = arith.constant dense<0.000000e+00> : vector<32x256xf32>
    %21 = tpu.matmul %1, %0, %cst {dimension_numbers = #tpu.dot_dimension_numbers<[1], [0], [0], [1], [0, 0, 1, 1], [], []>} : vector<32x4xbf16>, vector<4x256xbf16>, vector<32x256xf32> -> vector<32x256xf32>
    %22 = vector.extract_strided_slice %21 {offsets = [0, 0], sizes = [8, 256], strides = [1, 1]} : vector<32x256xf32> to vector<8x256xf32>
    %c2_i32 = arith.constant 2 : i32
    %23 = tpu.dynamic_rotate %22 by %c2_i32 dim 1 : vector<8x256xf32>, i32 -> vector<8x256xf32>
    %c2_i32_11 = arith.constant 2 : i32
    %24 = vector.broadcast %c2_i32_11 : i32 to vector<8x256xi32>
    %25 = arith.cmpi sge, %20, %24 : vector<8x256xi32>
    %cst_12 = arith.constant 0.000000e+00 : f32
    %26 = vector.broadcast %cst_12 : f32 to vector<8x256xf32>
    %27 = arith.select %25, %23, %26 : vector<8x256xi1>, vector<8x256xf32>
    %28 = vector.extract_strided_slice %21 {offsets = [8, 0], sizes = [8, 256], strides = [1, 1]} : vector<32x256xf32> to vector<8x256xf32>
    %29 = arith.addf %27, %28 : vector<8x256xf32>
    %30 = vector.extract_strided_slice %21 {offsets = [16, 0], sizes = [8, 256], strides = [1, 1]} : vector<32x256xf32> to vector<8x256xf32>
    %c254_i32 = arith.constant 254 : i32
    %31 = tpu.dynamic_rotate %30 by %c254_i32 dim 1 : vector<8x256xf32>, i32 -> vector<8x256xf32>
    %c126_i32 = arith.constant 126 : i32
    %32 = vector.broadcast %c126_i32 : i32 to vector<8x256xi32>
    %33 = arith.cmpi slt, %20, %32 : vector<8x256xi32>
    %cst_13 = arith.constant 0.000000e+00 : f32
    %34 = vector.broadcast %cst_13 : f32 to vector<8x256xf32>
    %35 = arith.select %33, %31, %34 : vector<8x256xi1>, vector<8x256xf32>
    %36 = arith.addf %29, %35 : vector<8x256xf32>
    %37 = vector.extract_strided_slice %3 {offsets = [0, 0, 0], sizes = [1, 8, 1], strides = [1, 1, 1]} : vector<3x8x1xf32> to vector<1x8x1xf32>
    %38 = vector.shape_cast %37 : vector<1x8x1xf32> to vector<8x1xf32>
    %39 = vector.broadcast %38 : vector<8x1xf32> to vector<8x256xf32>
    %40 = arith.addf %36, %39 : vector<8x256xf32>
    %cst_14 = arith.constant 0.000000e+00 : f32
    %41 = vector.broadcast %cst_14 : f32 to vector<8x256xf32>
    %42 = arith.maximumf %40, %41 : vector<8x256xf32>
    %43 = vector.extract_strided_slice %21 {offsets = [24, 0], sizes = [8, 256], strides = [1, 1]} : vector<32x256xf32> to vector<8x256xf32>
    %44 = vector.extract_strided_slice %3 {offsets = [2, 0, 0], sizes = [1, 8, 1], strides = [1, 1, 1]} : vector<3x8x1xf32> to vector<1x8x1xf32>
    %45 = vector.shape_cast %44 : vector<1x8x1xf32> to vector<8x1xf32>
    %46 = vector.broadcast %45 : vector<8x1xf32> to vector<8x256xf32>
    %47 = arith.addf %43, %46 : vector<8x256xf32>
    %48 = arith.truncf %42 : vector<8x256xf32> to vector<8x256xbf16>
    %cst_15 = arith.constant dense<0.000000e+00> : vector<24x256xf32>
    %49 = tpu.matmul %2, %48, %cst_15 {dimension_numbers = #tpu.dot_dimension_numbers<[1], [0], [0], [1], [0, 0, 1, 1], [], []>} : vector<24x8xbf16>, vector<8x256xbf16>, vector<24x256xf32> -> vector<24x256xf32>
    %50 = vector.extract_strided_slice %49 {offsets = [0, 0], sizes = [8, 256], strides = [1, 1]} : vector<24x256xf32> to vector<8x256xf32>
    %c2_i32_16 = arith.constant 2 : i32
    %51 = tpu.dynamic_rotate %50 by %c2_i32_16 dim 1 : vector<8x256xf32>, i32 -> vector<8x256xf32>
    %c2_i32_17 = arith.constant 2 : i32
    %52 = vector.broadcast %c2_i32_17 : i32 to vector<8x256xi32>
    %53 = arith.cmpi sge, %20, %52 : vector<8x256xi32>
    %cst_18 = arith.constant 0.000000e+00 : f32
    %54 = vector.broadcast %cst_18 : f32 to vector<8x256xf32>
    %55 = arith.select %53, %51, %54 : vector<8x256xi1>, vector<8x256xf32>
    %56 = vector.extract_strided_slice %49 {offsets = [8, 0], sizes = [8, 256], strides = [1, 1]} : vector<24x256xf32> to vector<8x256xf32>
    %57 = arith.addf %55, %56 : vector<8x256xf32>
    %58 = vector.extract_strided_slice %49 {offsets = [16, 0], sizes = [8, 256], strides = [1, 1]} : vector<24x256xf32> to vector<8x256xf32>
    %c254_i32_19 = arith.constant 254 : i32
    %59 = tpu.dynamic_rotate %58 by %c254_i32_19 dim 1 : vector<8x256xf32>, i32 -> vector<8x256xf32>
    %c126_i32_20 = arith.constant 126 : i32
    %60 = vector.broadcast %c126_i32_20 : i32 to vector<8x256xi32>
    %61 = arith.cmpi slt, %20, %60 : vector<8x256xi32>
    %cst_21 = arith.constant 0.000000e+00 : f32
    %62 = vector.broadcast %cst_21 : f32 to vector<8x256xf32>
    %63 = arith.select %61, %59, %62 : vector<8x256xi1>, vector<8x256xf32>
    %64 = arith.addf %57, %63 : vector<8x256xf32>
    %65 = vector.extract_strided_slice %3 {offsets = [1, 0, 0], sizes = [1, 8, 1], strides = [1, 1, 1]} : vector<3x8x1xf32> to vector<1x8x1xf32>
    %66 = vector.shape_cast %65 : vector<1x8x1xf32> to vector<8x1xf32>
    %67 = vector.broadcast %66 : vector<8x1xf32> to vector<8x256xf32>
    %68 = arith.addf %64, %67 : vector<8x256xf32>
    %cst_22 = arith.constant 0.000000e+00 : f32
    %69 = vector.broadcast %cst_22 : f32 to vector<8x256xf32>
    %70 = arith.maximumf %68, %69 : vector<8x256xf32>
    %71 = arith.addf %70, %47 : vector<8x256xf32>
    %cst_23 = arith.constant 0.000000e+00 : f32
    %72 = vector.broadcast %cst_23 : f32 to vector<8x256xf32>
    %73 = arith.maximumf %71, %72 : vector<8x256xf32>
    %c0_24 = arith.constant 0 : index
    %c0_25 = arith.constant 0 : index
    %74 = vector.load %arg5[%c0_24, %c0_25] : memref<8x256xf32, #tpu.memory_space<vmem>>, vector<8x256xf32>
    tpu.vector_store %arg5[%c0_24, %c0_25], %73 {strides = array<i32>} : memref<8x256xf32, #tpu.memory_space<vmem>>, vector<8x256xf32>,
    %c0_26 = arith.constant 0 : index
    %c0_27 = arith.constant 0 : index
    %75 = vector.load %arg6[%c0_26, %c0_27] : memref<8x256xf32, #tpu.memory_space<vmem>>, vector<8x256xf32>
    tpu.vector_store %arg6[%c0_26, %c0_27], %70 {strides = array<i32>} : memref<8x256xf32, #tpu.memory_space<vmem>>, vector<8x256xf32>,
    return
  }
  func.func @transform_0(%arg0: i32) -> (i32, i32) {
    %c0_i32 = arith.constant 0 : i32
    %c0_i32_0 = arith.constant 0 : i32
    return %c0_i32, %arg0 : i32, i32
  }
  func.func @transform_1(%arg0: i32) -> (i32, i32) {
    %c0_i32 = arith.constant 0 : i32
    %c0_i32_0 = arith.constant 0 : i32
    %c0_i32_1 = arith.constant 0 : i32
    return %c0_i32, %c0_i32_0 : i32, i32
  }
  func.func @transform_2(%arg0: i32) -> (i32, i32) {
    %c0_i32 = arith.constant 0 : i32
    %c0_i32_0 = arith.constant 0 : i32
    %c0_i32_1 = arith.constant 0 : i32
    return %c0_i32, %c0_i32_0 : i32, i32
  }
  func.func @transform_3(%arg0: i32) -> (i32, i32, i32) {
    %c0_i32 = arith.constant 0 : i32
    %c0_i32_0 = arith.constant 0 : i32
    %c0_i32_1 = arith.constant 0 : i32
    %c0_i32_2 = arith.constant 0 : i32
    return %c0_i32, %c0_i32_0, %c0_i32_1 : i32, i32, i32
  }
  func.func @transform_4(%arg0: i32) -> (i32, i32) {
    %c0_i32 = arith.constant 0 : i32
    %c0_i32_0 = arith.constant 0 : i32
    return %c0_i32, %arg0 : i32, i32
  }
  func.func @transform_5(%arg0: i32) -> (i32, i32) {
    %c0_i32 = arith.constant 0 : i32
    %c0_i32_0 = arith.constant 0 : i32
    return %c0_i32, %arg0 : i32, i32
  }
}

</mosaic_0001>

<bundles_post_ra>
// kernel: tpu_custom_call.1
= control target key start
LH: loop header
LB: loop body
LE: loop exit
PB: predicated region body
PF: predicated region fallthrough
CT: control target
= control target key end

     0   :  { %11 = vsyncpa [#allocation3], 0  ;;  %vm86_vm0 = vcmask 1041408   ;;  %v398_v3 = vmov 0   ;;  %vm79_vm1 = vcmask 31744   ;;  %s547_s0 = inlined_call_operand.vmem [shape: bf16[4,256], index: 0, kind: input, shape index: {}]   ;;  %s548_s1 = inlined_call_operand.vmem [shape: bf16[32,4], index: 1, kind: input, shape index: {}]   ;;  %s549_s2 = inlined_call_operand.vmem [shape: bf16[24,8], index: 2, kind: input, shape index: {}]   ;;  %s550_s3 = inlined_call_operand.vmem [shape: f32[3,8,1], index: 3, kind: input, shape index: {}]   ;;  %s551_s4 = inlined_call_operand.hbm [shape: f32[8,256], index: 4, kind: output, shape index: {0}]   ;;  %s552_s5 = inlined_call_operand.hbm [shape: f32[8,256], index: 5, kind: output, shape index: {1}]  }
   0x1   :  { %v330_v0 = vld.sshfl [vmem:[%s547_s0] sm:$0x33 pattern:$0x76325410]  ;;  %125 = vmatprep.mubr.bf16.mxu0 %v398_v3  ;;  %344 = vset.pattern.permute.xlu0 %v398_v3 }
   0x2   :  { %v78_v1 = vcombine.high %v330_v0, %v330_v0  ;;  %v88_v2 = vsel %vm86_vm0, %v330_v0, 0  ;;  %v346_v4 = vld [vmem:[%s548_s1] sm:$0xff]   ;;  %244 = vmatprep.mubr.bf16.mxu1 %v398_v3  ;;  %345 = vset.pattern.permute.xlu1 %v398_v3 }
   0x3   :  { %v30_v5 = vld [vmem:[%s550_s3] sm:$0xff] }
   0x4   :  { %331 = vmatprep.subr.msk.bf16.mxu0 %vm86_vm0, %v78_v1  ;;  %174 = vperm.xlu0 %344, %v30_v5  }
   0x5   :  { %94 = vmatpush1.bf16.msra.mxu0 %v88_v2 }
   0x6   :  { %12 = vsyncpa [#allocation5], 0  ;;  %v347_v6 = vld [vmem:[%s548_s1 + $0x8] sm:$0xff]   ;;  %s399_s25 = smov 2   ;;  %s400_s26 = smov 126   ;;  %v32_v15 = vld [vmem:[%s550_s3 + $0x10] sm:$0xff]  ;;  %v33_v17 = vlaneseq }
   0x7   :  { %v31_v16 = vld [vmem:[%s550_s3 + $0x8] sm:$0xff]  ;;  %vm205_vm7 = vcmask 1043456   ;;  %v348_v47 = vld [vmem:[%s549_s2] sm:$0xff]   ;;  %vm198_vm8 = vcmask 64512   ;;  %s402_s9 = smov [#allocation2]  }
   0x8   :  { %332 = vmatmul.mubr.msk.bf16.vlgmr.msra.gmra.mrb[0].mxu0 %vm79_vm1, %v346_v4  ;;  %v464_v18 = vand.u32 127, %v33_v17  ;;  %v349_v48 = vld [vmem:[%s549_s2 + $0x8] ss:$0 sps:$4 sm:$0xff]   ;;  %s401_s2 = smov [#allocation4]   ;;  %s306_s10 = sshll.u32 %s402_s9, 4  ;;  %s307_s10 = int_to_ptr.vmem [resolvable:$true] %s306_s10 }
   0x9   :  { %135 = vmatprep.mubr.bf16.mxu0 %v398_v3  ;;  %s316_s8 = sshll.u32 %s401_s2, 4  ;;  %s317_s8 = int_to_ptr.vmem [resolvable:$true] %s316_s8 }
   0xa   :  { %v35_v20 = vadd.s32 128, %v464_v18  ;;  %vm150_vm2 = vcmp.lt.s32.totalorder %v464_v18, 2  ;;  %vm153_vm3 = vcmp.ge.s32.totalorder %v464_v18, 2  ;;  %vm163_vm5 = vcmp.lt.s32.totalorder %v464_v18, 126  ;;  %s350_s11 = scalar_lea.vmem %s317_s8, 256  ;;  %p355_p1 = scmp.lt.s32.totalorder %s317_s8, %s317_s8 }
   0xb   :  { %p351_p0 = scmp.ne.s32.totalorder %s317_s8, %s350_s11  ;;  %p356_p2 = scmp.lt.s32.totalorder %s350_s11, %s350_s11 }
   0xc   :  { %v47_v21 = vand.u32 127, %v35_v20 }
   0xd   :  { %p357_p3 = por %p356_p2, %p355_p1 }
   0xe   :  { %vm469_vm4 = vcmp.ge.s32.totalorder %v47_v21, 2  ;;  %vm482_vm6 = vcmp.lt.s32.totalorder %v47_v21, 126 }
   0xf   :  { %p358_p4 = pnand %p357_p3, %p351_p0 }
  0x10   :  { %333 = vmatmul.mubr.msk.bf16.gmra.mrb[4].mxu0 %vm79_vm1, %v347_v6 }
  0x83   :  { %v175_v19 = vpop.permute.xlu0 %174 }
  0xdb   :  { %v127_v7 = vpop.f32.mrb[0].mxu0 }
  0xdc   :  { %146 = vrot.lane.b32.xlu0 %v127_v7, %s399_s25  ;;  %v129_v8 = vpop.f32.mrb[1].mxu0 }
  0xdd   :  { %148 = vrot.lane.b32.xlu1 %v129_v8, %s399_s25  ;;  %v131_v9 = vpop.f32.mrb[2].mxu0 }
  0xde   :  { %v133_v10 = vpop.f32.mrb[3].mxu0 }
  0xe3   :  { %v137_v11 = vpop.f32.mrb[4].mxu0 }
  0xe4   :  { %159 = vrot.lane.b32.xlu1 %v137_v11, %s400_s26  ;;  %v139_v12 = vpop.f32.mrb[5].mxu0 }
  0xe5   :  { %161 = vrot.lane.b32.xlu0 %v139_v12, %s400_s26  ;;  %v454_v13 = vpop.f32.mrb[6].mxu0 }
  0xe6   :  { %v456_v14 = vpop.f32.mrb[7].mxu0 }
  0xe8   :  { %285 = vperm.xlu1 %345, %v31_v16  }
  0xe9   :  { %183 = vperm.xlu0 %344, %v32_v15  }
 0x14e   :  { %v147_v22 = vpop.permute.xlu0 %146 }
 0x14f   :  { %v149_v23 = vpop.permute.xlu1 %148 }
 0x150   :  { %v151_v25 = vsel %vm150_vm2, %v147_v22, %v149_v23  ;;  %v152_v26 = vsel %vm150_vm2, %v149_v23, %v147_v22 }
 0x151   :  { %v155_v27 = vsel %vm153_vm3, %v152_v26, 0.0  ;;  %v156_v28 = vsel %vm469_vm4, %v151_v25, 0.0 }
 0x152   :  { %v157_v32 = vadd.f32 %v155_v27, %v131_v9  ;;  %v158_v33 = vadd.f32 %v156_v28, %v133_v10 }
 0x156   :  { %v160_v29 = vpop.permute.xlu1 %159 }
 0x157   :  { %v162_v31 = vpop.permute.xlu0 %161 }
 0x158   :  { %v164_v34 = vsel %vm163_vm5, %v160_v29, %v162_v31  ;;  %v165_v35 = vsel %vm163_vm5, %v162_v31, %v160_v29 }
 0x159   :  { %v168_v36 = vsel %vm163_vm5, %v164_v34, 0.0  ;;  %v169_v37 = vsel %vm482_vm6, %v165_v35, 0.0 }
 0x15a   :  { %v170_v38 = vadd.f32 %v168_v36, %v157_v32  ;;  %v171_v39 = vadd.f32 %v169_v37, %v158_v33 }
 0x15c   :  { %v178_v40 = vadd.f32 %v175_v19, %v171_v39  ;;  %v177_v41 = vadd.f32 %v175_v19, %v170_v38 }
 0x15e   :  { %v180_v42 = vmax.f32 %v178_v40, 0.0  ;;  %v179_v43 = vmax.f32 %v177_v41, 0.0 }
 0x160   :  { %v189_v44 = vpack.c.bf16 %v180_v42, %v180_v42  ;;  %v188_v45 = vpack.c.bf16 %v179_v43, %v179_v43 }
 0x162   :  { %336 = vmatprep.subr.msk.bf16.mxu1 %vm205_vm7, %v189_v44  ;;  %v207_v46 = vsel %vm205_vm7, %v188_v45, 0 }
 0x163   :  { %213 = vmatpush1.bf16.msra.mxu1 %v207_v46 }
 0x166   :  { %337 = vmatmul.mubr.msk.bf16.vlgmr.msra.gmra.mrb[0].mxu1 %vm198_vm8, %v348_v47 }
 0x167   :  { %254 = vmatprep.mubr.bf16.mxu1 %v398_v3  ;;  %v286_v57 = vpop.permute.xlu1 %285 }
 0x168   :  { %v184_v58 = vpop.permute.xlu0 %183 }
 0x169   :  { %v186_v15 = vadd.f32 %v184_v58, %v454_v13  ;;  %v187_v16 = vadd.f32 %v184_v58, %v456_v14 }
 0x16e   :  { %338 = vmatmul.mubr.msk.bf16.gmra.mrb[4].mxu1 %vm198_vm8, %v349_v48 }
 0x239   :  { %v246_v49 = vpop.f32.mrb[0].mxu1 }
 0x23a   :  { %263 = vrot.lane.b32.xlu0 %v246_v49, %s399_s25  ;;  %v248_v50 = vpop.f32.mrb[1].mxu1 }
 0x23b   :  { %265 = vrot.lane.b32.xlu1 %v248_v50, %s399_s25  ;;  %v250_v51 = vpop.f32.mrb[2].mxu1 }
 0x23c   :  { %v252_v52 = vpop.f32.mrb[3].mxu1 }
 0x241   :  { %v256_v53 = vpop.f32.mrb[4].mxu1 }
 0x242   :  { %273 = vrot.lane.b32.xlu1 %v256_v53, %s400_s26  ;;  %v258_v54 = vpop.f32.mrb[5].mxu1 }
 0x243   :  { %275 = vrot.lane.b32.xlu0 %v258_v54, %s400_s26  ;;  %v260_v55 = vpop.f32.mrb[6].mxu1 }
 0x244   :  { %v261_v56 = vpop.f32.mrb[7].mxu1 }
 0x2ac   :  { %v264_v59 = vpop.permute.xlu0 %263 }
 0x2ad   :  { %v266_v60 = vpop.permute.xlu1 %265 }
 0x2ae   :  { %v267_v61 = vsel %vm150_vm2, %v264_v59, %v266_v60  ;;  %v268_v62 = vsel %vm150_vm2, %v266_v60, %v264_v59 }
 0x2af   :  { %v269_v63 = vsel %vm153_vm3, %v268_v62, 0.0  ;;  %v270_v0 = vsel %vm469_vm4, %v267_v61, 0.0 }
 0x2b0   :  { %v271_v3 = vadd.f32 %v269_v63, %v250_v51  ;;  %v272_v4 = vadd.f32 %v270_v0, %v252_v52 }
 0x2b4   :  { %v274_v1 = vpop.permute.xlu1 %273 }
 0x2b5   :  { %v276_v2 = vpop.permute.xlu0 %275 }
 0x2b6   :  { %v277_v5 = vsel %vm163_vm5, %v274_v1, %v276_v2  ;;  %v278_v6 = vsel %vm163_vm5, %v276_v2, %v274_v1 }
 0x2b7   :  { %v279_v7 = vsel %vm163_vm5, %v277_v5, 0.0  ;;  %v280_v8 = vsel %vm482_vm6, %v278_v6, 0.0 }
 0x2b8   :  { %v281_v9 = vadd.f32 %v279_v7, %v271_v3  ;;  %v282_v10 = vadd.f32 %v280_v8, %v272_v4 }
 0x2ba   :  { %v288_v11 = vadd.f32 %v286_v57, %v281_v9  ;;  %v289_v12 = vadd.f32 %v286_v57, %v282_v10 }
 0x2bc   :  { %v290_v17 = vmax.f32 %v288_v11, 0.0  ;;  %v291_v19 = vmax.f32 %v289_v12, 0.0 }
 0x2be   :  { %v292_v18 = vadd.f32 %v290_v17, %v186_v15  ;;  %v293_v20 = vadd.f32 %v291_v19, %v187_v16  ;;  %298 = vst [vmem:[#allocation4] sm:$0xff] %v290_v17  ;;  %299 = vst [vmem:[#allocation4 + $0x8] sm:$0xff] %v291_v19 }
 0x2bf   :  { %361 = shalt.err (!%p358_p4)
}
 0x2c0   :  { %s362_s14 = scalar_lea.hbm %s552_s5, 256 }
 0x2c1   :  { %p363_p5 = scmp.ne.s32.totalorder %s552_s5, %s362_s14  ;;  %p366_p6 = scmp.lt.u32.totalorder %s362_s14, %s552_s5 }
 0x2c3   :  { %p368_p7 = pnand %p366_p6, %p363_p5 }
 0x2c5   :  { %371 = shalt.err (!%p368_p7)
}
 0x2c6   :  { %319 = dma.vmem_to_hbm [thread:$0]  %s317_s8, 256, %s552_s5, [#allocation5]   ;;  %v294_v13 = vmax.f32 %v292_v18, 0.0  ;;  %v295_v14 = vmax.f32 %v293_v20, 0.0 }
 0x2c7   :  { %s372_s21 = scalar_lea.vmem %s307_s10, 256  ;;  %p377_p9 = scmp.lt.s32.totalorder %s307_s10, %s307_s10 }
 0x2c8   :  { %296 = vst [vmem:[#allocation2] sm:$0xff] %v294_v13  ;;  %297 = vst [vmem:[#allocation2 + $0x8] sm:$0xff] %v295_v14  ;;  %p373_p8 = scmp.ne.s32.totalorder %s307_s10, %s372_s21  ;;  %p378_p10 = scmp.lt.s32.totalorder %s372_s21, %s372_s21 }
 0x2ca   :  { %p379_p11 = por %p378_p10, %p377_p9 }
 0x2cc   :  { %p380_p12 = pnand %p379_p11, %p373_p8 }
 0x2ce   :  { %383 = shalt.err (!%p380_p12)
}
 0x2cf   :  { %s384_s0 = scalar_lea.hbm %s551_s4, 256 }
 0x2d0   :  { %p385_p13 = scmp.ne.s32.totalorder %s551_s4, %s384_s0  ;;  %p388_p0 = scmp.lt.u32.totalorder %s384_s0, %s551_s4 }
 0x2d2   :  { %p390_p1 = pnand %p388_p0, %p385_p13 }
 0x2d4   :  { %393 = shalt.err (!%p390_p1)
}
 0x2d5   :  { %309 = dma.vmem_to_hbm [thread:$0]  %s307_s10, 256, %s551_s4, [#allocation3]  }
 0x2d6   :  { %394 = dma.done.wait [#allocation3], 256  }
 0x2d7   :  { %395 = vsyncadd [#allocation3], 4294967040 }
 0x2d8   :  { %396 = dma.done.wait [#allocation5], 256  }
 0x2d9   :  { %397 = vsyncadd [#allocation5], 4294967040 }
 0x2da   :  { %326 = vsyncpa [#allocation3], 1 }
 0x2db   :  { %327 = vsyncpa [#allocation5], 1 }

</bundles_post_ra>
